<compile_context>
chip_gen: v6e
topology: v6e:2x2x1
jax: 0.10.0
libtpu: 0.0.40
codegen_flags: <defaults>
</compile_context>

<pallas_src>
import jax
import jax.numpy as jnp
from jax.experimental import pallas as pl
from jax.experimental.pallas import tpu as pltpu


def _round_up(x, m):
    return ((x + m - 1) // m) * m


def _mlp_softmax_kernel(x_ref, w1_ref, b1_ref, w2_ref, b2_ref, o_ref):
    # fc1: (TB, Din) @ (Din, H) with f32 accumulation; bias add + ReLU in f32.
    h = jnp.dot(x_ref[...], w1_ref[...], preferred_element_type=jnp.float32)
    h = jnp.maximum(h + b1_ref[...], 0.0)

    # fc2: (TB, H) @ (H, Dout) with f32 accumulation; bias add in f32.
    # h is cast to the MXU compute dtype (tiny extra precision loss vs f32; fine for a
    # classifier and documented per the review).
    logits = jnp.dot(h.astype(w2_ref.dtype), w2_ref[...],
                     preferred_element_type=jnp.float32)
    logits = logits + b2_ref[...]

    # Numerically-stable softmax over the last axis (== PyTorch dim=1 for 2-D input).
    # Exact divide so rows sum to 1 to f32 precision.
    m = jnp.max(logits, axis=-1, keepdims=True)
    e = jnp.exp(logits - m)
    s = jnp.sum(e, axis=-1, keepdims=True)
    o_ref[...] = (e / s).astype(o_ref.dtype)


def prepare_params(w1, b1, w2, b2, compute_dtype=jnp.bfloat16):
    """Call-invariant parameter prep: weights -> MXU compute dtype, biases -> f32 row vectors.
    Call once at init; question_type_classifier() also accepts raw params (the casts are
    then cheap per-call converts, no padding passes)."""
    return (jnp.asarray(w1, compute_dtype),
            jnp.asarray(b1, jnp.float32).reshape(1, -1),
            jnp.asarray(w2, compute_dtype),
            jnp.asarray(b2, jnp.float32).reshape(1, -1))


def question_type_classifier(x, w1, b1, w2, b2, *,
                             compute_dtype=jnp.bfloat16, batch_tile=None):
    """x: (B, input_dim); w1: (input_dim, hidden); b1: (hidden,);
    w2: (hidden, output_dim); b2: (output_dim,).  Returns (B, output_dim) float32.

    compute_dtype: dtype fed to the MXU (bfloat16 default: native fast path on
    v5e/v6e/v7x and half the HBM/VMEM bytes for x and the weights); accumulation,
    bias/ReLU and softmax always run in f32.
    """
    B, d_in = x.shape
    hidden = w1.shape[-1]
    d_out = w2.shape[-1]
    cbytes = jnp.dtype(compute_dtype).itemsize

    w1p, b1p, w2p, b2p = prepare_params(w1, b1, w2, b2, compute_dtype)
    xp = jnp.asarray(x, compute_dtype)

    if batch_tile is None:
        # Big tiles amortize the ~0.35 us per-grid-step overhead; footprint formula uses the
        # actual compute-dtype bytes, double-buffered x/out tiles + resident weights, and the
        # f32 hidden/logits intermediates once.  Budget leaves headroom on v7x (64 MiB VMEM).
        batch_tile = 1024
        budget = 40 * 1024 * 1024
        wbytes = (2 * (d_in * hidden + hidden * d_out) * cbytes   # double-buffered weights
                  + 2 * (hidden + d_out) * 4)                     # double-buffered f32 biases

        def _tile_bytes(tb):
            return (wbytes
                    + 2 * tb * d_in * cbytes        # double-buffered x tiles
                    + 2 * tb * d_out * 4            # double-buffered f32 out tiles
                    + tb * (hidden + d_out) * 4)    # f32 hidden + logits intermediates (once)

        while batch_tile > 8 and _tile_bytes(batch_tile) > budget:
            batch_tile //= 2
        # v7x has 2 TensorCores: keep >=2 grid steps so the parallel batch axis uses both.
        batch_tile = min(batch_tile, _round_up(pl.cdiv(B, 2), 8))
    batch_tile = max(8, _round_up(min(batch_tile, _round_up(B, 8)), 8))

    grid = (pl.cdiv(B, batch_tile),)   # ragged last tile; OOB writes are masked by Pallas

    out = pl.pallas_call(
        _mlp_softmax_kernel,
        out_shape=jax.ShapeDtypeStruct((B, d_out), jnp.float32),
        grid_spec=pltpu.PrefetchScalarGridSpec(
            num_scalar_prefetch=0,
            grid=grid,
            in_specs=[
                pl.BlockSpec((batch_tile, d_in), lambda i: (i, 0)),   # x tile (pipelined)
                pl.BlockSpec((d_in, hidden), lambda i: (0, 0)),       # w1 resident
                pl.BlockSpec((1, hidden), lambda i: (0, 0)),          # b1 resident (f32)
                pl.BlockSpec((hidden, d_out), lambda i: (0, 0)),      # w2 resident
                pl.BlockSpec((1, d_out), lambda i: (0, 0)),           # b2 resident (f32)
            ],
            out_specs=pl.BlockSpec((batch_tile, d_out), lambda i: (i, 0)),
        ),
        compiler_params=pltpu.CompilerParams(
            dimension_semantics=("parallel",),       # shard batch tiles over v7x's 2 TCs
            vmem_limit_bytes=48 * 1024 * 1024,       # headroom on v7x's 64 MiB physical VMEM
        ),
    )(xp, w1p, b1p, w2p, b2p)
    return out


def _reference(x, w1, b1, w2, b2):
    h = jnp.maximum(x @ w1 + b1, 0.0)
    return jax.nn.softmax(h @ w2 + b2, axis=1)


if __name__ == "__main__":
    key = jax.random.PRNGKey(0)

    # --- small shapes consistent with the module forward: x is (batch, input_dim) ---
    batch, input_dim, hidden_dim, output_dim = 2, 32, 64, 16
    kx, k1, k2, k3, k4 = jax.random.split(key, 5)
    x = jax.random.normal(kx, (batch, input_dim), dtype=jnp.float32)
    bound1 = 1.0 / (input_dim ** 0.5)
    w1 = jax.random.uniform(k1, (input_dim, hidden_dim), jnp.float32, -bound1, bound1)
    b1 = jax.random.uniform(k2, (hidden_dim,), jnp.float32, -bound1, bound1)
    bound2 = 1.0 / (hidden_dim ** 0.5)
    w2 = jax.random.uniform(k3, (hidden_dim, output_dim), jnp.float32, -bound2, bound2)
    b2 = jax.random.uniform(k4, (output_dim,), jnp.float32, -bound2, bound2)

    ref = _reference(x, w1, b1, w2, b2)

    # Default path: bf16 MXU inputs, f32 accumulation / bias / ReLU / softmax.
    out_bf16 = jax.block_until_ready(question_type_classifier(x, w1, b1, w2, b2))
    assert out_bf16.shape == (batch, output_dim)
    assert jnp.allclose(out_bf16, ref, atol=3e-2, rtol=3e-2), "mismatch vs reference (bf16)"
    assert jnp.allclose(jnp.sum(out_bf16, axis=1), 1.0, atol=1e-5), "softmax rows must sum to 1"

    # Full-f32 MXU path (tighter check).
    out_f32 = jax.block_until_ready(
        question_type_classifier(x, w1, b1, w2, b2, compute_dtype=jnp.float32))
    assert out_f32.shape == (batch, output_dim)
    assert jnp.allclose(out_f32, ref, atol=2e-3, rtol=2e-3), "mismatch vs reference (f32)"
    assert jnp.allclose(jnp.sum(out_f32, axis=1), 1.0, atol=1e-5), "softmax rows must sum to 1"

    # --- multi-step batch grid with a ragged last tile (300 = 2*128 + 44) + non-128 widths ---
    batch2, in2, hid2, out2 = 300, 96, 160, 20
    kx2, k5, k6, k7, k8 = jax.random.split(jax.random.fold_in(key, 1), 5)
    x2 = jax.random.normal(kx2, (batch2, in2), dtype=jnp.float32)
    w1b = jax.random.uniform(k5, (in2, hid2), jnp.float32, -0.1, 0.1)
    b1b = jax.random.uniform(k6, (hid2,), jnp.float32, -0.1, 0.1)
    w2b = jax.random.uniform(k7, (hid2, out2), jnp.float32, -0.1, 0.1)
    b2b = jax.random.uniform(k8, (out2,), jnp.float32, -0.1, 0.1)
    out_b = jax.block_until_ready(
        question_type_classifier(x2, w1b, b1b, w2b, b2b, batch_tile=128))
    ref_b = _reference(x2, w1b, b1b, w2b, b2b)
    assert out_b.shape == (batch2, out2)
    assert jnp.allclose(out_b, ref_b, atol=2e-2, rtol=2e-2), "mismatch vs reference (ragged grid)"
    assert jnp.allclose(jnp.sum(out_b, axis=1), 1.0, atol=1e-5), "softmax rows must sum to 1"

    print("KERNEL_OK")
</pallas_src>

<mosaic_0001>
module attributes {stable_mosaic.version = 11 : i64} {
  func.func @_mlp_softmax_kernel(%arg0: i32, %arg1: memref<8x32xbf16, #tpu.memory_space<vmem>>, %arg2: memref<32x64xbf16, #tpu.memory_space<vmem>>, %arg3: memref<1x64xf32, #tpu.memory_space<vmem>>, %arg4: memref<64x16xbf16, #tpu.memory_space<vmem>>, %arg5: memref<1x16xf32, #tpu.memory_space<vmem>>, %arg6: memref<8x16xf32, #tpu.memory_space<vmem>>) attributes {dimension_semantics = [#tpu.dimension_semantics<parallel>], iteration_bounds = array<i64: 1>, scalar_prefetch = 0 : i64, scratch_operands = 0 : i64, tpu.core_type = #tpu.core_type<tc>, window_params = [{transform_indices = @transform_0, window_bounds = array<i64: 8, 32>}, {pipeline_mode = #tpu.pipeline_mode<synchronous>, transform_indices = @transform_1, window_bounds = array<i64: 32, 64>}, {pipeline_mode = #tpu.pipeline_mode<synchronous>, transform_indices = @transform_2, window_bounds = array<i64: 1, 64>}, {pipeline_mode = #tpu.pipeline_mode<synchronous>, transform_indices = @transform_3, window_bounds = array<i64: 64, 16>}, {pipeline_mode = #tpu.pipeline_mode<synchronous>, transform_indices = @transform_4, window_bounds = array<i64: 1, 16>}, {transform_indices = @transform_5, window_bounds = array<i64: 8, 16>}]} {
    %c0 = arith.constant 0 : index
    %c0_0 = arith.constant 0 : index
    %0 = vector.load %arg1[%c0, %c0_0] : memref<8x32xbf16, #tpu.memory_space<vmem>>, vector<8x32xbf16>
    %c0_1 = arith.constant 0 : index
    %c0_2 = arith.constant 0 : index
    %1 = vector.load %arg2[%c0_1, %c0_2] : memref<32x64xbf16, #tpu.memory_space<vmem>>, vector<32x64xbf16>
    %cst = arith.constant dense<0.000000e+00> : vector<8x64xf32>
    %2 = tpu.matmul %0, %1, %cst {dimension_numbers = #tpu.dot_dimension_numbers<[1], [0], [0], [1], [0, 0, 1, 1], [], []>} : vector<8x32xbf16>, vector<32x64xbf16>, vector<8x64xf32> -> vector<8x64xf32>
    %c0_3 = arith.constant 0 : index
    %c0_4 = arith.constant 0 : index
    %3 = vector.load %arg3[%c0_3, %c0_4] : memref<1x64xf32, #tpu.memory_space<vmem>>, vector<1x64xf32>
    %4 = vector.broadcast %3 : vector<1x64xf32> to vector<8x64xf32>
    %5 = arith.addf %2, %4 : vector<8x64xf32>
    %cst_5 = arith.constant 0.000000e+00 : f32
    %6 = vector.broadcast %cst_5 : f32 to vector<8x64xf32>
    %7 = arith.maximumf %5, %6 : vector<8x64xf32>
    %8 = arith.truncf %7 : vector<8x64xf32> to vector<8x64xbf16>
    %c0_6 = arith.constant 0 : index
    %c0_7 = arith.constant 0 : index
    %9 = vector.load %arg4[%c0_6, %c0_7] : memref<64x16xbf16, #tpu.memory_space<vmem>>, vector<64x16xbf16>
    %cst_8 = arith.constant dense<0.000000e+00> : vector<8x16xf32>
    %10 = tpu.matmul %8, %9, %cst_8 {dimension_numbers = #tpu.dot_dimension_numbers<[1], [0], [0], [1], [0, 0, 1, 1], [], []>} : vector<8x64xbf16>, vector<64x16xbf16>, vector<8x16xf32> -> vector<8x16xf32>
    %c0_9 = arith.constant 0 : index
    %c0_10 = arith.constant 0 : index
    %11 = vector.load %arg5[%c0_9, %c0_10] : memref<1x16xf32, #tpu.memory_space<vmem>>, vector<1x16xf32>
    %12 = vector.broadcast %11 : vector<1x16xf32> to vector<8x16xf32>
    %13 = arith.addf %10, %12 : vector<8x16xf32>
    %cst_11 = arith.constant dense<0xFF800000> : vector<8xf32>
    %14 = vector.multi_reduction <maximumf>, %13, %cst_11 [1] : vector<8x16xf32> to vector<8xf32>
    %15 = vector.shape_cast %14 : vector<8xf32> to vector<8x1xf32>
    %16 = vector.broadcast %15 : vector<8x1xf32> to vector<8x16xf32>
    %17 = arith.subf %13, %16 : vector<8x16xf32>
    %18 = math.exp %17 : vector<8x16xf32>
    %cst_12 = arith.constant dense<0.000000e+00> : vector<8xf32>
    %19 = vector.multi_reduction <add>, %18, %cst_12 [1] : vector<8x16xf32> to vector<8xf32>
    %20 = vector.shape_cast %19 : vector<8xf32> to vector<8x1xf32>
    %21 = vector.broadcast %20 : vector<8x1xf32> to vector<8x16xf32>
    %22 = arith.divf %18, %21 : vector<8x16xf32>
    %c0_13 = arith.constant 0 : index
    %c0_14 = arith.constant 0 : index
    %23 = vector.load %arg6[%c0_13, %c0_14] : memref<8x16xf32, #tpu.memory_space<vmem>>, vector<8x16xf32>
    tpu.vector_store %arg6[%c0_13, %c0_14], %22 {strides = array<i32>} : memref<8x16xf32, #tpu.memory_space<vmem>>, vector<8x16xf32>,
    return
  }
  func.func @transform_0(%arg0: i32) -> (i32, i32) {
    %c0_i32 = arith.constant 0 : i32
    %c0_i32_0 = arith.constant 0 : i32
    return %arg0, %c0_i32 : i32, i32
  }
  func.func @transform_1(%arg0: i32) -> (i32, i32) {
    %c0_i32 = arith.constant 0 : i32
    %c0_i32_0 = arith.constant 0 : i32
    %c0_i32_1 = arith.constant 0 : i32
    return %c0_i32, %c0_i32_0 : i32, i32
  }
  func.func @transform_2(%arg0: i32) -> (i32, i32) {
    %c0_i32 = arith.constant 0 : i32
    %c0_i32_0 = arith.constant 0 : i32
    %c0_i32_1 = arith.constant 0 : i32
    return %c0_i32, %c0_i32_0 : i32, i32
  }
  func.func @transform_3(%arg0: i32) -> (i32, i32) {
    %c0_i32 = arith.constant 0 : i32
    %c0_i32_0 = arith.constant 0 : i32
    %c0_i32_1 = arith.constant 0 : i32
    return %c0_i32, %c0_i32_0 : i32, i32
  }
  func.func @transform_4(%arg0: i32) -> (i32, i32) {
    %c0_i32 = arith.constant 0 : i32
    %c0_i32_0 = arith.constant 0 : i32
    %c0_i32_1 = arith.constant 0 : i32
    return %c0_i32, %c0_i32_0 : i32, i32
  }
  func.func @transform_5(%arg0: i32) -> (i32, i32) {
    %c0_i32 = arith.constant 0 : i32
    %c0_i32_0 = arith.constant 0 : i32
    return %arg0, %c0_i32 : i32, i32
  }
}

</mosaic_0001>

<bundles_post_ra>
// kernel: tpu_custom_call.1
= control target key start
LH: loop header
LB: loop body
LE: loop exit
PB: predicated region body
PF: predicated region fallthrough
CT: control target
= control target key end

     0   :  { %10 = vsyncpa [#allocation3], 0  ;;  %v46_v1 = vlaneseq  ;;  %v311_v2 = vmov 0.0   ;;  %vm312_vm0 = vmmov 0   ;;  %v313_v8 = vmov 1966171168   ;;  %s389_s0 = inlined_call_operand.vmem [shape: bf16[2,32], index: 0, kind: input, shape index: {}]   ;;  %s390_s1 = inlined_call_operand.vmem [shape: bf16[32,64], index: 1, kind: input, shape index: {}]   ;;  %s391_s2 = inlined_call_operand.vmem [shape: f32[1,64], index: 2, kind: input, shape index: {}]   ;;  %s392_s3 = inlined_call_operand.vmem [shape: bf16[64,16], index: 3, kind: input, shape index: {}]   ;;  %s393_s4 = inlined_call_operand.vmem [shape: f32[1,16], index: 4, kind: input, shape index: {}]   ;;  %s394_s5 = inlined_call_operand.hbm [shape: f32[2,16], index: 5, kind: output, shape index: {}]  }
   0x1   :  { %v279_v0 = vld [vmem:[%s390_s1 + $0x8] sm:$0xff]   ;;  %253 = vmatprep.subr.bf16.mxu0 %v311_v2  ;;  %261 = vmatprep.subr.bf16.mxu1 %v311_v2  ;;  %v280_v3 = vld [vmem:[%s390_s1] sm:$0xff]   ;;  %v44_v9 = vunpack.c.l.s4 %v313_v8  ;;  %v281_v11 = vld [vmem:[%s392_s3 + $0x18] sm:$0xff]   ;;  %vm77_vm1 = vcmask 261120   ;;  %vm162_vm2 = vcmask 523264   ;;  %vm206_vm3 = vcmask 130048  }
   0x2   :  { %254 = vmatpush3.bf16.msra.mxu0 %v279_v0  ;;  %v22_v4 = vld [vmem:[%s389_s0] sm:$0x1]  ;;  %v23_v5 = vld [vmem:[%s389_s0 + $0x1] sm:$0x1]  ;;  %257 = vmatprep.mubr.msk.bf16.mxu0 %vm312_vm0, %v311_v2  ;;  %v24_v6 = vld [vmem:[%s389_s0 + $0x2] sm:$0x1] }
   0x3   :  { %255 = vmatprep.subr.bf16.mxu0 %v311_v2  ;;  %v25_v7 = vld [vmem:[%s389_s0 + $0x3] sm:$0x1]  ;;  %v47_v10 = vshrl.u32 %v46_v1, 7  ;;  %269 = vmatprep.mubr.msk.bf16.mxu1 %vm312_vm0, %v311_v2  ;;  %v41_v12 = vcombine.low %v22_v4, %v23_v5  ;;  %v45_v14 = vunpack.c.0.s8 %v44_v9  ;;  %v282_v15 = vld [vmem:[%s392_s3 + $0x10] sm:$0xff]   ;;  %v283_v21 = vld [vmem:[%s392_s3 + $0x8] sm:$0xff]  }
   0x4   :  { %v42_v13 = vcombine.low %v24_v6, %v25_v7  ;;  %262 = vmatpush3.bf16.msra.mxu1 %v281_v11  ;;  %v284_v22 = vld [vmem:[%s392_s3] sm:$0xff]  }
   0x5   :  { %v48_v16 = vsub.s32 %v45_v14, %v47_v10  ;;  %263 = vmatprep.subr.bf16.mxu1 %v311_v2  ;;  %v235_v23 = vld [vmem:[%s391_s2] ss:$0 sm:$0xff] }
   0x6   :  { %256 = vmatpush3.bf16.msra.mxu0 %v280_v3  ;;  %v239_v31 = vld [vmem:[%s393_s4] ss:$0 sm:$0xff] }
   0x7   :  { %v49_v17 = vrot.slane %v41_v12, %v48_v16  ;;  %v56_v18 = vrot.slane %v42_v13, %v48_v16 }
   0x8   :  { %264 = vmatpush3.bf16.msra.mxu1 %v282_v15 }
   0x9   :  { %v57_v19 = vcombine.low %v49_v17, %v56_v18  ;;  %265 = vmatprep.subr.bf16.mxu1 %v311_v2 }
   0xb   :  { %v64_v20 = vrot.slane %v57_v19, %v48_v16 }
   0xc   :  { %266 = vmatpush3.bf16.msra.mxu1 %v283_v21 }
   0xd   :  { %258 = vmatmul.mubr.msk.bf16.vlgmr.msra.gmra.mxu0 %vm77_vm1, %v64_v20  ;;  %267 = vmatprep.subr.bf16.mxu1 %v311_v2 }
  0x10   :  { %268 = vmatpush3.bf16.msra.mxu1 %v284_v22 }
  0xcd   :  { %v115_v24 = vpop.f32.mrf.mxu0 }
  0xce   :  { %v116_v25 = vadd.f32 %v235_v23, %v115_v24 }
  0xcf   :  { %v259_v26 = vpop.f32.mrf.mxu0 }
  0xd0   :  { %v121_v27 = vmax.f32 %v116_v25, 0.0 }
  0xd1   :  { %v118_v28 = vpop.f32.mrf.mxu0 }
  0xd2   :  { %v122_v29 = vpack.c.bf16 %v121_v27, %v121_v27 }
  0xd3   :  { %v260_v30 = vpop.f32.mrf.mxu0 }
  0xd4   :  { %270 = vmatmul.mubr.msk.bf16.vlgmr.msra.gmra.mxu1 %vm162_vm2, %v122_v29 }
 0x194   :  { %v200_v32 = vpop.f32.mrf.mxu1 }
 0x195   :  { %v201_v33 = vadd.f32 %v239_v31, %v200_v32 }
 0x196   :  { %v271_v34 = vpop.f32.mrf.mxu1 }
 0x197   :  { %v207_v35 = vsel %vm206_vm3, %v201_v33, -inf }
 0x198   :  { %208 = vmax.xlane.f32.xlu0 %v207_v35  ;;  %v203_v36 = vpop.f32.mrf.mxu1 }
 0x19a   :  { %v272_v37 = vpop.f32.mrf.mxu1 }
 0x221   :  { %v209_v38 = vpop.xlane.xlu0 %208 }
 0x222   :  { %v210_v39 = vsub.f32 %v201_v33, %v209_v38 }
 0x224   :  { %v211_v40 = vmul.f32 1.442695, %v210_v39 }
 0x226   :  { %285 = vpow2.f32 %v211_v40 }
 0x233   :  { %v286_v41 = vpop.eup %285 }
 0x234   :  { %v213_v42 = vsel %vm206_vm3, %v286_v41, 0.0 }
 0x235   :  { %214 = vadd.xlane.f32.xlu0 %v213_v42 }
 0x2be   :  { %v215_v43 = vpop.xlane.xlu0 %214 }
 0x2bf   :  { %287 = vrcp.f32 %v215_v43 }
 0x2cc   :  { %v288_v44 = vpop.eup %287 }
 0x2cd   :  { %v217_v45 = vmul.f32 %v288_v44, %v286_v41 }
 0x2cf   :  { %218 = vst.msk [vmem:[#allocation2] sm:$0xff] %vm206_vm3, %v217_v45 }
 0x2d0   :  { %223 = vsyncadd [#allocation3], 96  ;;  %s314_s2 = smov [#allocation2]  }
 0x2d1   :  { %s224_s3 = sshll.u32 %s314_s2, 4  ;;  %s225_s3 = int_to_ptr.vmem [resolvable:$true] %s224_s3 }
 0x2d2   :  { %s289_s4 = scalar_lea.vmem %s225_s3, 32  ;;  %s293_s15 = scalar_lea.vmem %s225_s3, 128 }
 0x2d3   :  { %p290_p0 = scmp.ne.s32.totalorder %s225_s3, %s289_s4  ;;  %p294_p1 = scmp.lt.s32.totalorder %s225_s3, %s225_s3 }
 0x2d4   :  { %p295_p2 = scmp.lt.s32.totalorder %s293_s15, %s289_s4 }
 0x2d6   :  { %p296_p3 = por %p295_p2, %p294_p1 }
 0x2d8   :  { %p297_p4 = pnand %p296_p3, %p290_p0 }
 0x2da   :  { %300 = shalt.err (!%p297_p4)
}
 0x2db   :  { %s315_s16 = smov 32   ;;  %s316_s17 = smov 2  }
 0x2dc   :  { %230 = dma.vmem_to_hbm [thread:$0]  %s225_s3, 32, %s394_s5, [#allocation3], %s315_s16, %s315_s16, %s316_s17  }
 0x2dd   :  { %309 = dma.done.wait [#allocation3], 128  }
 0x2de   :  { %310 = vsyncadd [#allocation3], 4294967168 }
 0x2df   :  { %234 = vsyncpa [#allocation3], 1 }

</bundles_post_ra>
